<compile_context>
chip_gen: v5e
topology: v5e:2x2
jax: 0.10.0
libtpu: 0.0.40
codegen_flags: <defaults>
</compile_context>

<pallas_src>
import functools

import jax
import jax.numpy as jnp
from jax import lax
from jax.experimental import pallas as pl
from jax.experimental.pallas import tpu as pltpu


# ---------------------------------------------------------------------------
# Single-invocation kernel (small n_dims / non-tileable shapes).
# ---------------------------------------------------------------------------
def _cov_full_kernel(a_ref, o_ref, *, eps, compute_dtype):
    # a_ref: (n_dims, rank) in VMEM, o_ref: (n_dims, n_dims) in VMEM.
    a = a_ref[...].astype(compute_dtype)
    # Contract the rank dim of both operands directly (no explicit a.T).
    gram = lax.dot_general(
        a, a,
        dimension_numbers=(((1,), (1,)), ((), ())),
        preferred_element_type=jnp.float32,
    )
    n = o_ref.shape[0]
    row = lax.broadcasted_iota(jnp.int32, (n, n), 0)
    col = lax.broadcasted_iota(jnp.int32, (n, n), 1)
    # compare + add + select (cheaper than building eps*eye explicitly).
    o_ref[...] = jnp.where(row == col, gram + eps, gram).astype(o_ref.dtype)


def _covariance_full(A, eps, compute_dtype):
    n_dims, rank = A.shape
    kernel = functools.partial(
        _cov_full_kernel, eps=float(eps), compute_dtype=compute_dtype)
    extra = {}
    # Double-buffered input + output estimate; only raise the scoped VMEM
    # limit when the default (16 MiB on v5e) would be tight.
    est_vmem = 4 * (2 * n_dims * n_dims + 2 * n_dims * rank) + (4 << 20)
    if est_vmem > (16 << 20):
        extra["compiler_params"] = pltpu.CompilerParams(
            vmem_limit_bytes=min(est_vmem, 48 << 20))  # safe on 64 MiB v7x
    return pl.pallas_call(
        kernel,
        out_shape=jax.ShapeDtypeStruct((n_dims, n_dims), jnp.float32),
        in_specs=[pl.BlockSpec((n_dims, rank), lambda: (0, 0))],
        out_specs=pl.BlockSpec((n_dims, n_dims), lambda: (0, 0)),
        **extra,
    )(A)


# ---------------------------------------------------------------------------
# Tiled kernel: 2-D output grid + K-tiled accumulation.
# ---------------------------------------------------------------------------
def _cov_tiled_kernel(a_row_ref, a_col_ref, o_ref, acc_ref, *, eps,
                      compute_dtype):
    i = pl.program_id(0)
    j = pl.program_id(1)
    k = pl.program_id(2)

    @pl.when(k == 0)
    def _():
        acc_ref[...] = jnp.zeros_like(acc_ref)

    a_row = a_row_ref[...].astype(compute_dtype)   # (tm, tk)
    a_col = a_col_ref[...].astype(compute_dtype)   # (tn, tk)
    acc_ref[...] += lax.dot_general(
        a_row, a_col,
        dimension_numbers=(((1,), (1,)), ((), ())),
        preferred_element_type=jnp.float32,
    )

    last_k = pl.num_programs(2) - 1

    # Off-diagonal tiles: no identity work at all.
    @pl.when((k == last_k) & (i != j))
    def _():
        o_ref[...] = acc_ref[...].astype(o_ref.dtype)

    # Diagonal tiles (tm == tn so the local mask row==col is the true diag).
    @pl.when((k == last_k) & (i == j))
    def _():
        tm, tn = o_ref.shape
        row = lax.broadcasted_iota(jnp.int32, (tm, tn), 0)
        col = lax.broadcasted_iota(jnp.int32, (tm, tn), 1)
        g = acc_ref[...]
        o_ref[...] = jnp.where(row == col, g + eps, g).astype(o_ref.dtype)


def _covariance_tiled(A, eps, compute_dtype, tm, tn, tk):
    n_dims, rank = A.shape
    kernel = functools.partial(
        _cov_tiled_kernel, eps=float(eps), compute_dtype=compute_dtype)
    grid = (n_dims // tm, n_dims // tn, rank // tk)
    return pl.pallas_call(
        kernel,
        out_shape=jax.ShapeDtypeStruct((n_dims, n_dims), jnp.float32),
        grid_spec=pltpu.PrefetchScalarGridSpec(
            num_scalar_prefetch=0,
            grid=grid,
            in_specs=[
                # A delivered twice: once as the row-block, once as col-block.
                pl.BlockSpec((tm, tk), lambda i, j, k: (i, k)),
                pl.BlockSpec((tn, tk), lambda i, j, k: (j, k)),
            ],
            out_specs=pl.BlockSpec((tm, tn), lambda i, j, k: (i, j)),
            scratch_shapes=[pltpu.VMEM((tm, tn), jnp.float32)],
        ),
        compiler_params=pltpu.CompilerParams(
            dimension_semantics=("parallel", "parallel", "arbitrary")),
    )(A, A)


# ---------------------------------------------------------------------------
# Public entry point.
# ---------------------------------------------------------------------------
def _pick_tile(n, candidates):
    for c in candidates:
        if n % c == 0:
            return c
    return None


def covariance_forward(A: jax.Array, eps: float = 1e-16, *,
                       compute_dtype=jnp.float32) -> jax.Array:
    """Pallas implementation of Covariance.forward: A @ A.T + eps * I.

    compute_dtype=jnp.bfloat16 enables bf16 MXU inputs with f32 accumulation
    (3-8x MXU throughput on v6e/v7x, ~3 fewer decimal digits in the Gram).
    """
    n_dims, rank = A.shape
    tm = _pick_tile(n_dims, (256, 128))
    if tm is None or n_dims <= 256:
        # Small or non-128-divisible shapes: one full-block invocation.
        # TODO(synk): pad n_dims/rank for very large non-divisible shapes
        #             instead of a single oversized block.
        return _covariance_full(A, eps, compute_dtype)
    tk = _pick_tile(rank, (512, 256, 128)) or rank
    return _covariance_tiled(A, eps, compute_dtype, tm, tm, tk)


class Covariance:
    """Minimal JAX mirror of the PyTorch module (deterministic init)."""

    def __init__(self, n_dims, rank=None, eps=1e-16, key=None):
        if rank is None:
            rank = n_dims
        self.n_dims = n_dims
        self.rank = rank
        # NOTE: eps=1e-16 added in float32 is numerically a no-op when the
        # diagonal Gram entries are O(rank); the PyTorch original relies on
        # a wider dtype for the jitter to matter.
        self.eps = eps
        if key is None:
            key = jax.random.PRNGKey(0)
        self.A = jax.random.normal(key, (n_dims, rank), dtype=jnp.float32)

    def __call__(self, *args):
        return covariance_forward(self.A, self.eps)

    @property
    def value(self):
        return self()


if __name__ == "__main__":
    key = jax.random.PRNGKey(0)
    k1, k2 = jax.random.split(key)

    # --- Small shape (module defaults): single-invocation path. ---
    n1, r1 = 32, 16
    mod = Covariance(n_dims=n1, rank=r1, eps=1e-16, key=k1)
    out1 = jax.block_until_ready(mod())
    ref1 = (jnp.matmul(mod.A, mod.A.T, precision=lax.Precision.HIGHEST)
            + jnp.eye(n1, dtype=jnp.float32) * mod.eps)
    assert out1.shape == (n1, n1)
    assert jnp.allclose(out1, ref1, atol=1e-4, rtol=1e-5)

    # bf16-compute flag (gated; loose tolerance vs f32 reference).
    out1_bf16 = jax.block_until_ready(
        covariance_forward(mod.A, mod.eps, compute_dtype=jnp.bfloat16))
    assert jnp.allclose(out1_bf16, ref1, atol=2e-1, rtol=5e-2)

    # --- Larger shape: tiled path (2x2 output grid, 3-step K accumulation,
    #     diagonal-only eps with an eps large enough to be visible in f32). ---
    n2, r2, eps2 = 512, 384, 1e-3
    A2 = jax.random.normal(k2, (n2, r2), dtype=jnp.float32)
    out2 = jax.block_until_ready(covariance_forward(A2, eps2))
    ref2 = (jnp.matmul(A2, A2.T, precision=lax.Precision.HIGHEST)
            + jnp.eye(n2, dtype=jnp.float32) * eps2)
    assert out2.shape == (n2, n2)
    assert jnp.allclose(out2, ref2, atol=1e-3, rtol=1e-4)

    print("KERNEL_OK")
</pallas_src>

<mosaic_0001>
module attributes {stable_mosaic.version = 11 : i64} {
  func.func @_cov_full_kernel(%arg0: memref<32x16xf32, #tpu.memory_space<vmem>>, %arg1: memref<32x32xf32, #tpu.memory_space<vmem>>) attributes {dimension_semantics = [], scalar_prefetch = 0 : i64, scratch_operands = 0 : i64, tpu.core_type = #tpu.core_type<tc>} {
    %c0 = arith.constant 0 : index
    %c0_0 = arith.constant 0 : index
    %0 = vector.load %arg0[%c0, %c0_0] : memref<32x16xf32, #tpu.memory_space<vmem>>, vector<32x16xf32>
    %cst = arith.constant dense<0.000000e+00> : vector<32x32xf32>
    %1 = tpu.matmul %0, %0, %cst {dimension_numbers = #tpu.dot_dimension_numbers<[1], [1], [0], [0], [0, 0, 1, 0], [], []>} : vector<32x16xf32>, vector<32x16xf32>, vector<32x32xf32> -> vector<32x32xf32>
    %2 = tpu.iota {dimensions = array<i32: 0>} : vector<32x32xi32>
    %3 = tpu.iota {dimensions = array<i32: 1>} : vector<32x32xi32>
    %4 = arith.cmpi eq, %2, %3 : vector<32x32xi32>
    %cst_1 = arith.constant 1.000000e-16 : f32
    %5 = vector.broadcast %cst_1 : f32 to vector<32x32xf32>
    %6 = arith.addf %1, %5 : vector<32x32xf32>
    %7 = arith.select %4, %6, %1 : vector<32x32xi1>, vector<32x32xf32>
    %c0_2 = arith.constant 0 : index
    %c0_3 = arith.constant 0 : index
    %8 = vector.load %arg1[%c0_2, %c0_3] : memref<32x32xf32, #tpu.memory_space<vmem>>, vector<32x32xf32>
    tpu.vector_store %arg1[%c0_2, %c0_3], %7 {strides = array<i32>} : memref<32x32xf32, #tpu.memory_space<vmem>>, vector<32x32xf32>,
    return
  }
}

</mosaic_0001>

<bundles_post_ra>
// kernel: tpu_custom_call.1
= control target key start
LH: loop header
LB: loop body
LE: loop exit
PB: predicated region body
PF: predicated region fallthrough
CT: control target
= control target key end

     0   :  { %vm13_vm0 = vcmask 130048   ;;  %s198_s0 = inlined_call_operand.vmem [shape: f32[32,16], index: 0, kind: input, shape index: {}]   ;;  %s199_s1 = inlined_call_operand.hbm [shape: f32[32,32], index: 1, kind: output, shape index: {}]  }
   0x1   :  { %v12_v0 = vld [vmem:[%s198_s0 + $0x18] sm:$0xff] }
   0x2   :  { %106 = vmatpush.xpose.msk.msra.mxu2 %vm13_vm0, %v12_v0  ;;  %107 = vmatpush.xpose.msk.msra.mxu3 %vm13_vm0, %v12_v0 }
   0x3   :  { %6 = vsyncpa [#allocation3], 0  ;;  %97 = vmatpush.xpose.msk.msra.mxu0 %vm13_vm0, %v12_v0  ;;  %105 = vmatpush.xpose.msk.msra.mxu1 %vm13_vm0, %v12_v0  ;;  %v11_v1 = vld [vmem:[%s198_s0 + $0x10] sm:$0xff]  ;;  %v10_v2 = vld [vmem:[%s198_s0 + $0x8] sm:$0xff]  ;;  %v55_v4 = vlaneseq  ;;  %vm74_vm2 = vcmask 261120   ;;  %s85_s17 = sshll.u32 %s199_s1, 4  ;;  %s86_s17 = int_to_ptr.hbm [resolvable:$true] %s85_s17 }
   0x4   :  { %v9_v3 = vld [vmem:[%s198_s0] sm:$0xff]  ;;  %s146_s0 = smov [#allocation2]   ;;  %s147_s18 = smov 128  }
   0x5   :  { %v56_v5 = vshrl.u32 %v55_v4, 7  ;;  %v61_v6 = vand.u32 127, %v55_v4  ;;  %s83_s14 = sshll.u32 %s146_s0, 4  ;;  %s148_s19 = smov 8   ;;  %s84_s14 = int_to_ptr.vmem [resolvable:$true] %s83_s14 }
   0x6   :  { %109 = vmatpush.xpose.msk.msra.mxu2 %vm13_vm0, %v11_v1  ;;  %110 = vmatpush.xpose.msk.msra.mxu3 %vm13_vm0, %v11_v1 }
   0x7   :  { %98 = vmatpush.xpose.msk.msra.mxu0 %vm13_vm0, %v11_v1  ;;  %108 = vmatpush.xpose.msk.msra.mxu1 %vm13_vm0, %v11_v1  ;;  %v57_v7 = vadd.s32 8, %v56_v5  ;;  %vm62_vm1 = vcmp.eq.s32.totalorder %v56_v5, %v61_v6  ;;  %v58_v12 = vadd.s32 16, %v56_v5  ;;  %v59_v13 = vadd.s32 24, %v56_v5 }
   0x9   :  { %vm63_vm3 = vcmp.eq.s32.totalorder %v57_v7, %v61_v6  ;;  %vm64_vm4 = vcmp.eq.s32.totalorder %v58_v12, %v61_v6  ;;  %vm65_vm5 = vcmp.eq.s32.totalorder %v59_v13, %v61_v6 }
   0xa   :  { %112 = vmatpush.xpose.msk.msra.mxu2 %vm13_vm0, %v10_v2  ;;  %113 = vmatpush.xpose.msk.msra.mxu3 %vm13_vm0, %v10_v2 }
   0xb   :  { %99 = vmatpush.xpose.msk.msra.mxu0 %vm13_vm0, %v10_v2  ;;  %111 = vmatpush.xpose.msk.msra.mxu1 %vm13_vm0, %v10_v2 }
   0xe   :  { %115 = vmatpush.xpose.msk.msra.mxu2 %vm13_vm0, %v9_v3  ;;  %116 = vmatpush.xpose.msk.msra.mxu3 %vm13_vm0, %v9_v3 }
   0xf   :  { %100 = vmatpush.xpose.msk.msra.mxu0 %vm13_vm0, %v9_v3  ;;  %114 = vmatpush.xpose.msk.msra.mxu1 %vm13_vm0, %v9_v3 }
  0x11   :  { %103 = vmatmul.msk.f32.vlgmr.msra.gmra.mxu2 %vm13_vm0, %v11_v1  ;;  %104 = vmatmul.msk.f32.vlgmr.msra.gmra.mxu3 %vm13_vm0, %v12_v0 }
  0x12   :  { %101 = vmatmul.msk.f32.vlgmr.msra.gmra.mxu0 %vm13_vm0, %v9_v3  ;;  %102 = vmatmul.msk.f32.vlgmr.msra.gmra.mxu1 %vm13_vm0, %v10_v2 }
  0x8f   :  { %v43_v8 = vpop.f32.mrf.mxu0  ;;  %v46_v9 = vpop.f32.mrf.mxu1 }
  0x90   :  { %v66_v10 = vadd.f32 1e-16, %v43_v8  ;;  %v67_v11 = vadd.f32 1e-16, %v46_v9 }
  0x92   :  { %v70_v14 = vsel %vm62_vm1, %v66_v10, %v43_v8  ;;  %v71_v15 = vsel %vm63_vm3, %v67_v11, %v46_v9 }
  0x93   :  { %75 = vst.msk [vmem:[#allocation2] sm:$0xff] %vm74_vm2, %v70_v14 }
  0x94   :  { %76 = vst.msk [vmem:[#allocation2 + $0x8] sm:$0xff] %vm74_vm2, %v71_v15  ;;  %v49_v16 = vpop.f32.mrf.mxu2  ;;  %v52_v17 = vpop.f32.mrf.mxu3 }
  0x95   :  { %v68_v18 = vadd.f32 1e-16, %v49_v16  ;;  %v69_v19 = vadd.f32 1e-16, %v52_v17 }
  0x97   :  { %v72_v20 = vsel %vm64_vm4, %v68_v18, %v49_v16  ;;  %v73_v21 = vsel %vm65_vm5, %v69_v19, %v52_v17 }
  0x98   :  { %77 = vst.msk [vmem:[#allocation2 + $0x10] sm:$0xff] %vm74_vm2, %v72_v20 }
  0x99   :  { %78 = vst.msk [vmem:[#allocation2 + $0x18] sm:$0xff] %vm74_vm2, %v73_v21 }
  0x9a   :  { %91 = dma.vmem_to_hbm [thread:$0]  %s84_s14, 512, %s86_s17, [#allocation3], %s147_s18, %s147_s18, %s148_s19  }
  0x9b   :  { %144 = dma.done.wait [#allocation3], 512  }
  0x9c   :  { %145 = vsyncadd [#allocation3], 4294966784 }
  0x9d   :  { %96 = vsyncpa [#allocation3], 1 }

</bundles_post_ra>
